<compile_context>
chip_gen: v6e
topology: v6e:2x2x1
jax: 0.10.0
libtpu: 0.0.40
codegen_flags: <defaults>
</compile_context>

<pallas_src>
import jax
import jax.numpy as jnp
from jax.experimental import pallas as pl
from jax.experimental.pallas import tpu as pltpu


def _identity_kernel(x_ref, o_ref):
    # Pass-through: the registered 'forward' flow applied to the input tile.
    o_ref[...] = x_ref[...]


def _lane_dense_2d(x: jax.Array) -> jax.Array:
    """Flatten to (rows, cols) with cols a large multiple of 128 when possible."""
    total = x.size
    for cols in (2048, 1024, 512, 256, 128):
        if total % cols == 0:
            return x.reshape(total // cols, cols)
    # Fallback: keep the original last axis on lanes; full-extent blocks on the
    # lane axis remain legal even if not a multiple of 128.
    return x.reshape(-1, x.shape[-1])


def _pick_tile_rows(rows: int, cols: int, itemsize: int) -> int:
    """Row-tile sizing: ~2 MiB blocks, sublane-friendly, >=2 grid steps, and
    preferring tile sizes that divide `rows` exactly (no masked last block)."""
    if rows < 16:
        return rows  # tiny input: single (full-extent) block
    target_bytes = 2 << 20                           # ~2 MiB per block per buffer
    tr = target_bytes // max(1, cols * itemsize)
    tr = max(8, min(tr, rows // 2))                  # keep >= 2 grid steps (v7x: 2 TCs)
    tr = (tr // 8) * 8                               # (8, 128) sublane divisibility
    # Prefer the largest multiple-of-8 divisor of rows that is <= tr.
    for cand in range(tr, 7, -8):
        if rows % cand == 0:
            return cand
    return max(8, tr)                                # partial last block (masked) fallback


def flow_forward(x: jax.Array) -> jax.Array:
    """Mimics Module.__call__(x) -> self.flow(x) for the default 'forward' flow."""
    orig_shape = x.shape
    x2d = _lane_dense_2d(x)
    rows, cols = x2d.shape
    tile_r = _pick_tile_rows(rows, cols, x2d.dtype.itemsize)
    grid = (pl.cdiv(rows, tile_r),)

    out2d = pl.pallas_call(
        _identity_kernel,
        out_shape=jax.ShapeDtypeStruct((rows, cols), x2d.dtype),
        grid=grid,
        in_specs=[pl.BlockSpec((tile_r, cols), lambda i: (i, 0))],
        out_specs=pl.BlockSpec((tile_r, cols), lambda i: (i, 0)),
        input_output_aliases={0: 0},  # output reuses the input HBM buffer
        compiler_params=pltpu.CompilerParams(
            dimension_semantics=("parallel",),
        ),
    )(x2d)

    return out2d.reshape(orig_shape)


class PallasFlowModule:
    """Thin JAX-side analogue of the FlowModule dispatch machinery."""

    def __init__(self):
        self._flows = {
            "forward": self.forward,          # identity via Pallas kernel
            "passthrough": self.passthrough,  # zero-cost identity (no kernel)
        }
        self._flow = self._flows["forward"]

    def set_flow(self, name):
        self._flow = self._flows[name]

    def __call__(self, *inputs, flow=None, **kwargs):
        if flow is not None:
            self.set_flow(flow)
        return self._flow(*inputs, **kwargs)

    def forward(self, x):
        return flow_forward(x)

    def passthrough(self, x):
        # No HBM traffic at all; same semantics as the identity flow.
        return x

    def parameters(self):
        return []  # base Module defines no parameters

    def optimizable_parameters(self):
        return []


if __name__ == "__main__":
    key = jax.random.PRNGKey(0)
    x = jax.random.normal(key, (2, 4, 16, 16), dtype=jnp.float32)  # NCHW

    module = PallasFlowModule()
    y = module(x, flow="forward")
    y = jax.block_until_ready(y)

    assert y.shape == x.shape and y.dtype == x.dtype
    assert bool(jnp.allclose(y, x)), "identity flow mismatch"

    # Zero-cost flow keeps the same semantics.
    z = jax.block_until_ready(module(x, flow="passthrough"))
    assert bool(jnp.allclose(z, x))

    print("KERNEL_OK")
</pallas_src>

<mosaic_0001>
module attributes {stable_mosaic.version = 11 : i64} {
  func.func @_identity_kernel(%arg0: i32, %arg1: memref<1x2048xf32, #tpu.memory_space<vmem>>, %arg2: memref<1x2048xf32, #tpu.memory_space<vmem>>) attributes {dimension_semantics = [#tpu.dimension_semantics<parallel>], iteration_bounds = array<i64: 1>, scalar_prefetch = 0 : i64, scratch_operands = 0 : i64, tpu.core_type = #tpu.core_type<tc>, window_params = [{transform_indices = @transform_0, window_bounds = array<i64: 1, 2048>}, {transform_indices = @transform_1, window_bounds = array<i64: 1, 2048>}]} {
    %c0 = arith.constant 0 : index
    %c0_0 = arith.constant 0 : index
    %0 = vector.load %arg1[%c0, %c0_0] : memref<1x2048xf32, #tpu.memory_space<vmem>>, vector<1x2048xf32>
    %c0_1 = arith.constant 0 : index
    %c0_2 = arith.constant 0 : index
    %1 = vector.load %arg2[%c0_1, %c0_2] : memref<1x2048xf32, #tpu.memory_space<vmem>>, vector<1x2048xf32>
    tpu.vector_store %arg2[%c0_1, %c0_2], %0 {strides = array<i32>} : memref<1x2048xf32, #tpu.memory_space<vmem>>, vector<1x2048xf32>,
    return
  }
  func.func @transform_0(%arg0: i32) -> (i32, i32) {
    %c0_i32 = arith.constant 0 : i32
    %c0_i32_0 = arith.constant 0 : i32
    return %arg0, %c0_i32 : i32, i32
  }
  func.func @transform_1(%arg0: i32) -> (i32, i32) {
    %c0_i32 = arith.constant 0 : i32
    %c0_i32_0 = arith.constant 0 : i32
    return %arg0, %c0_i32 : i32, i32
  }
}

</mosaic_0001>

<bundles_post_ra>
// kernel: tpu_custom_call.1
= control target key start
LH: loop header
LB: loop body
LE: loop exit
PB: predicated region body
PF: predicated region fallthrough
CT: control target
= control target key end

     0   :  { %6 = vsyncpa [#allocation3], 0  ;;  %s104_s0 = inlined_call_operand.hbm [shape: f32[1,2048], index: 0, kind: input, shape index: {}, may-alias: {0,1}]   ;;  %s105_s1 = inlined_call_operand.hbm [shape: f32[1,2048], index: 1, kind: output, shape index: {}, may-alias: {0,1}]  }
   0x1   :  { %7 = vsyncpa [#allocation4], 0  ;;  %s86_s6 = smov [#allocation2]  }
   0x2   :  { %s14_s7 = sshll.u32 %s86_s6, 4  ;;  %s15_s7 = int_to_ptr.vmem [resolvable:$true] %s14_s7 }
   0x3   :  { %s50_s8 = scalar_lea.vmem %s15_s7, 256  ;;  %p55_p1 = scmp.lt.s32.totalorder %s15_s7, %s15_s7 }
   0x4   :  { %p51_p0 = scmp.ne.s32.totalorder %s15_s7, %s50_s8  ;;  %p56_p2 = scmp.lt.s32.totalorder %s50_s8, %s50_s8 }
   0x6   :  { %p57_p3 = por %p56_p2, %p55_p1 }
   0x8   :  { %p58_p4 = pnand %p57_p3, %p51_p0 }
   0xa   :  { %61 = shalt.err (!%p58_p4)
}
   0xb   :  { %17 = dma.hbm_to_vmem [thread:$0]  %s104_s0, 256, %s15_s7, [#allocation3]  }
   0xc   :  { %82 = dma.done.wait [#allocation3], 256  }
   0xd   :  { %83 = vsyncadd [#allocation3], 4294967040  ;;  %s87_s11 = smov [#allocation5]   ;;  %v21_v0 = vld [vmem:[#allocation2] sm:$0xff]  ;;  %v22_v1 = vld [vmem:[#allocation2 + $0x8] sm:$0xff] }
   0xe   :  { %s31_s12 = sshll.u32 %s87_s11, 4  ;;  %23 = vst [vmem:[#allocation5] sm:$0xff] %v21_v0  ;;  %24 = vst [vmem:[#allocation5 + $0x8] sm:$0xff] %v22_v1  ;;  %s32_s12 = int_to_ptr.vmem [resolvable:$true] %s31_s12 }
   0xf   :  { %s62_s13 = scalar_lea.vmem %s32_s12, 256  ;;  %p67_p6 = scmp.lt.s32.totalorder %s32_s12, %s32_s12 }
  0x10   :  { %p63_p5 = scmp.ne.s32.totalorder %s32_s12, %s62_s13  ;;  %p68_p7 = scmp.lt.s32.totalorder %s62_s13, %s62_s13 }
  0x12   :  { %p69_p8 = por %p68_p7, %p67_p6 }
  0x14   :  { %p70_p9 = pnand %p69_p8, %p63_p5 }
  0x16   :  { %73 = shalt.err (!%p70_p9)
}
  0x17   :  { %34 = dma.vmem_to_hbm [thread:$0]  %s32_s12, 256, %s105_s1, [#allocation4]  }
  0x18   :  { %84 = dma.done.wait [#allocation4], 256  }
  0x19   :  { %85 = vsyncadd [#allocation4], 4294967040 }
  0x1a   :  { %38 = vsyncpa [#allocation3], 1 }
  0x1b   :  { %39 = vsyncpa [#allocation4], 1 }

</bundles_post_ra>
